<compile_context>
chip_gen: v5e
topology: v5e:2x2
jax: 0.10.0
libtpu: 0.0.40
codegen_flags: <defaults>
</compile_context>

<pallas_src>
import jax
import jax.numpy as jnp
from jax.experimental import pallas as pl
from jax.experimental.pallas import tpu as pltpu


def _vmem_budget_bytes():
    """Generation-aware (per-buffer block budget, scoped VMEM limit)."""
    cap = None
    try:
        cap = getattr(pltpu.get_tpu_info(), "vmem_capacity_bytes", None)
    except Exception:
        cap = None
    if not cap:
        cap = 64 << 20  # conservative: v7x per-TensorCore VMEM
    target = int(max(2 << 20, min(8 << 20, cap // 16)))   # 8 MiB v5e/v6e, 4 MiB v7x
    limit = int(min(64 << 20, max(32 << 20, cap // 2)))   # 64 MiB v5e/v6e, 32 MiB v7x
    return target, limit


# ---------------------------------------------------------------------------
# Path A: per-sample skip-read kernel (scalar-prefetched keep mask + manual DMA)
# ---------------------------------------------------------------------------
def _make_skip_kernel(inv_p):
    def kernel(keep_ref, x_hbm, o_ref, xbuf, sem):
        i = pl.program_id(0)
        keep = keep_ref[i] != 0

        @pl.when(keep)
        def _():
            # Only kept samples ever touch HBM for the read.
            cp = pltpu.make_async_copy(x_hbm.at[i], xbuf, sem)
            cp.start()
            cp.wait()
            # inv_p is a compile-time constant; multiply in the native dtype.
            o_ref[...] = (xbuf[...] * inv_p).astype(o_ref.dtype)

        @pl.when(jnp.logical_not(keep))
        def _():
            o_ref[...] = jnp.zeros_like(o_ref)

    return kernel


def _stochastic_depth_skip(x2, keep_i32, inv_p, vmem_limit):
    n, k = x2.shape
    k128 = k // 128
    x3 = x2.reshape(n, k128, 128)  # lane-dense per-sample slab (pure plumbing)

    out3 = pl.pallas_call(
        _make_skip_kernel(inv_p),
        out_shape=jax.ShapeDtypeStruct((n, k128, 128), x2.dtype),
        grid_spec=pltpu.PrefetchScalarGridSpec(
            num_scalar_prefetch=1,
            grid=(n,),
            in_specs=[pl.BlockSpec(memory_space=pl.ANY)],  # raw HBM ref, manual DMA
            out_specs=pl.BlockSpec((None, k128, 128), lambda i, keep: (i, 0, 0)),
            scratch_shapes=[
                pltpu.VMEM((k128, 128), x2.dtype),
                pltpu.SemaphoreType.DMA,
            ],
        ),
        compiler_params=pltpu.CompilerParams(
            dimension_semantics=("parallel",),
            vmem_limit_bytes=vmem_limit,
        ),
    )(keep_i32, x3)
    return out3.reshape(n, k)


# ---------------------------------------------------------------------------
# Path B: dense auto-pipelined fallback
# ---------------------------------------------------------------------------
def _dense_kernel(scale_ref, x_ref, o_ref):
    # scale_ref: (BN, 1) f32 per-sample scale (0.0 or 1/p); x/o: (BN, BK) tiles.
    x = x_ref[...]
    s = scale_ref[...].astype(x.dtype)          # native-dtype multiply (no f32 upcast)
    o_ref[...] = (x * s).astype(o_ref.dtype)


def _choose_blocks(n, k, itemsize, target_bytes):
    """Pick (BN, BK) respecting (sublane, 128) alignment and a per-buffer budget."""
    sub = 8 * max(1, 4 // max(1, itemsize))            # 8 f32, 16 bf16, ...
    elems = max(128 * sub, target_bytes // itemsize)   # element budget per block

    if k * min(n, sub) <= elems:
        bk = k                                         # full lane extent (always legal)
        rows = elems // k
        bn = n if rows >= n else max(sub, (rows // sub) * sub)
        bn = min(bn, n)
    else:
        bn = n if n <= sub else sub
        bk = max(128, ((elems // bn) // 128) * 128)    # multiple of 128

    # Guarantee >= 2 grid steps on big tensors so both v7x TensorCores get work.
    if n * k * itemsize >= (1 << 20) and pl.cdiv(n, bn) * pl.cdiv(k, bk) < 2:
        if bn > sub:
            bn = max(sub, ((bn // 2 + sub - 1) // sub) * sub)
        elif bk >= 256:
            bk = ((bk // 2 + 127) // 128) * 128
        elif bn >= 2:
            bn = (bn + 1) // 2
    return bn, bk


def _stochastic_depth_dense(x2, scale_col, target_bytes, vmem_limit):
    n, k = x2.shape
    itemsize = jnp.dtype(x2.dtype).itemsize
    bn, bk = _choose_blocks(n, k, itemsize, target_bytes)
    grid = (pl.cdiv(n, bn), pl.cdiv(k, bk))

    return pl.pallas_call(
        _dense_kernel,
        out_shape=jax.ShapeDtypeStruct((n, k), x2.dtype),
        grid=grid,
        in_specs=[
            pl.BlockSpec((bn, 1), lambda i, j: (i, 0)),    # per-sample scale column
            pl.BlockSpec((bn, bk), lambda i, j: (i, j)),   # activation tile
        ],
        out_specs=pl.BlockSpec((bn, bk), lambda i, j: (i, j)),
        compiler_params=pltpu.CompilerParams(
            dimension_semantics=("parallel", "parallel"),
            vmem_limit_bytes=vmem_limit,
        ),
    )(scale_col, x2)


# ---------------------------------------------------------------------------
# Public wrapper
# ---------------------------------------------------------------------------
def stochastic_depth(x, key, survival_prob=0.8, training=True):
    """JAX/Pallas equivalent of StochasticDepth.forward (NCHW input)."""
    if not training:
        return x

    n = x.shape[0]
    k = 1
    for d in x.shape[1:]:
        k *= d
    x2 = x.reshape(n, k)  # lane-dense 2D layout (pure plumbing)

    # Per-sample uniform draw (equivalent of torch.rand(N,1,1,1)).
    u = jax.random.uniform(key, (n,), dtype=jnp.float32)
    keep = u < jnp.float32(survival_prob)

    # survival_prob == 0 is degenerate: output is all-zero here (PyTorch gives NaN).
    inv_p = (1.0 / survival_prob) if survival_prob > 0 else 0.0

    target_bytes, vmem_limit = _vmem_budget_bytes()
    itemsize = jnp.dtype(x.dtype).itemsize
    slab_bytes = k * itemsize

    if (k % 128 == 0) and slab_bytes <= target_bytes and survival_prob > 0:
        # Skip-read path: drop HBM reads of dropped samples entirely.
        out2 = _stochastic_depth_skip(x2, keep.astype(jnp.int32), inv_p, vmem_limit)
    else:
        # Dense fallback (odd feature sizes or per-sample slab too big for one block).
        scale_col = jnp.where(keep, jnp.float32(inv_p), jnp.float32(0.0)).reshape(n, 1)
        out2 = _stochastic_depth_dense(x2, scale_col, target_bytes, vmem_limit)
    return out2.reshape(x.shape)


if __name__ == "__main__":
    key = jax.random.PRNGKey(0)
    kx, kmask, kx2, kx3, kmask2 = jax.random.split(key, 5)
    p = 0.8

    def ref_fn(x, mkey, prob):
        u = jax.random.uniform(mkey, (x.shape[0],), dtype=jnp.float32)
        mask = (u < prob).astype(jnp.float32)[:, None, None, None]
        return ((x.astype(jnp.float32) / prob) * mask).astype(x.dtype)

    # --- Case 1: skip-read path (K = 4*16*16 = 1024, multiple of 128), f32 ---
    x = jax.random.normal(kx, (2, 4, 16, 16), dtype=jnp.float32)
    y = jax.block_until_ready(stochastic_depth(x, kmask, survival_prob=p, training=True))
    assert jnp.allclose(y, ref_fn(x, kmask, p), atol=1e-6, rtol=1e-6), "case 1 mismatch"

    # --- Case 2: dense fallback path (K = 3*14*14 = 588, not 128-aligned), f32 ---
    x2 = jax.random.normal(kx2, (2, 3, 14, 14), dtype=jnp.float32)
    y2 = jax.block_until_ready(stochastic_depth(x2, kmask, survival_prob=p, training=True))
    assert jnp.allclose(y2, ref_fn(x2, kmask, p), atol=1e-6, rtol=1e-6), "case 2 mismatch"

    # --- Case 3: skip-read path, bf16, low survival prob (exercises drop branch) ---
    x3 = jax.random.normal(kx3, (4, 4, 16, 16), dtype=jnp.bfloat16)
    y3 = jax.block_until_ready(stochastic_depth(x3, kmask2, survival_prob=0.4, training=True))
    ref3 = ref_fn(x3, kmask2, 0.4)
    assert jnp.allclose(y3.astype(jnp.float32), ref3.astype(jnp.float32),
                        atol=2e-2, rtol=2e-2), "case 3 mismatch"

    # --- Eval path (identity) ---
    y_eval = stochastic_depth(x, kmask, survival_prob=p, training=False)
    assert jnp.allclose(jax.block_until_ready(y_eval), x)

    print("KERNEL_OK")
</pallas_src>

<mosaic_0001>
module attributes {stable_mosaic.version = 11 : i64} {
  func.func @kernel(%arg0: i32, %arg1: memref<2xi32, #tpu.memory_space<smem>>, %arg2: memref<2x8x128xf32, #tpu.memory_space<any>>, %arg3: memref<1x8x128xf32, #tpu.memory_space<vmem>>, %arg4: memref<8x128xf32, #tpu.memory_space<vmem>>, %arg5: memref<!tpu.dma_semaphore, #tpu.memory_space<semaphore_mem>>) attributes {dimension_semantics = [#tpu.dimension_semantics<parallel>], iteration_bounds = array<i64: 2>, scalar_prefetch = 1 : i64, scratch_operands = 2 : i64, tpu.core_type = #tpu.core_type<tc>, window_params = [{}, {transform_indices = @transform_1, window_bounds = array<i64: 1, 8, 128>}]} {
    %0 = arith.index_cast %arg0 : i32 to index
    %1 = memref.load %arg1[%0] : memref<2xi32, #tpu.memory_space<smem>>
    %c0_i32 = arith.constant 0 : i32
    %2 = arith.cmpi ne, %1, %c0_i32 : i32
    %3 = arith.extui %2 : i1 to i32
    %c0_i32_0 = arith.constant 0 : i32
    %4 = arith.cmpi ne, %3, %c0_i32_0 : i32
    scf.if %4 {
      %c0_i32_2 = arith.constant 0 : i32
      %c0_i32_3 = arith.constant 0 : i32
      %8 = tpu.memref_slice %arg2[%arg0, %c0_i32_2, %c0_i32_3] : memref<2x8x128xf32, #tpu.memory_space<any>> -> memref<1x8x128xf32, #tpu.memory_space<any>>
      %9 = tpu.memref_squeeze %8 : memref<1x8x128xf32, #tpu.memory_space<any>> -> memref<8x128xf32, #tpu.memory_space<any>>
      tpu.enqueue_dma source(%9 : memref<8x128xf32, #tpu.memory_space<any>>) target(%arg4 : memref<8x128xf32, #tpu.memory_space<vmem>>) target_semaphore(%arg5 : memref<!tpu.dma_semaphore, #tpu.memory_space<semaphore_mem>>)
      %c0_i32_4 = arith.constant 0 : i32
      %c0_i32_5 = arith.constant 0 : i32
      %10 = tpu.memref_slice %arg2[%arg0, %c0_i32_4, %c0_i32_5] : memref<2x8x128xf32, #tpu.memory_space<any>> -> memref<1x8x128xf32, #tpu.memory_space<any>>
      %11 = tpu.memref_squeeze %10 : memref<1x8x128xf32, #tpu.memory_space<any>> -> memref<8x128xf32, #tpu.memory_space<any>>
      tpu.wait_dma2 semaphore(%arg5 : memref<!tpu.dma_semaphore, #tpu.memory_space<semaphore_mem>>) src(%11 : memref<8x128xf32, #tpu.memory_space<any>>) dst(%arg4 : memref<8x128xf32, #tpu.memory_space<vmem>>)
      %c0 = arith.constant 0 : index
      %c0_6 = arith.constant 0 : index
      %12 = vector.load %arg4[%c0, %c0_6] : memref<8x128xf32, #tpu.memory_space<vmem>>, vector<8x128xf32>
      %cst = arith.constant 1.250000e+00 : f32
      %13 = vector.broadcast %cst : f32 to vector<8x128xf32>
      %14 = arith.mulf %12, %13 : vector<8x128xf32>
      %c0_7 = arith.constant 0 : index
      %c0_8 = arith.constant 0 : index
      %c0_9 = arith.constant 0 : index
      %15 = vector.load %arg3[%c0_7, %c0_8, %c0_9] : memref<1x8x128xf32, #tpu.memory_space<vmem>>, vector<1x8x128xf32>
      %16 = vector.shape_cast %15 : vector<1x8x128xf32> to vector<8x128xf32>
      %17 = vector.shape_cast %14 : vector<8x128xf32> to vector<1x8x128xf32>
      tpu.vector_store %arg3[%c0_7, %c0_8, %c0_9], %17 {strides = array<i32>} : memref<1x8x128xf32, #tpu.memory_space<vmem>>, vector<1x8x128xf32>,
    } else {
    }
    %true = arith.constant true
    %5 = arith.xori %2, %true : i1
    %6 = arith.extui %5 : i1 to i32
    %c0_i32_1 = arith.constant 0 : i32
    %7 = arith.cmpi ne, %6, %c0_i32_1 : i32
    scf.if %7 {
      %cst = arith.constant 0.000000e+00 : f32
      %8 = vector.broadcast %cst : f32 to vector<8x128xf32>
      %c0 = arith.constant 0 : index
      %c0_2 = arith.constant 0 : index
      %c0_3 = arith.constant 0 : index
      %9 = vector.load %arg3[%c0, %c0_2, %c0_3] : memref<1x8x128xf32, #tpu.memory_space<vmem>>, vector<1x8x128xf32>
      %10 = vector.shape_cast %9 : vector<1x8x128xf32> to vector<8x128xf32>
      %11 = vector.shape_cast %8 : vector<8x128xf32> to vector<1x8x128xf32>
      tpu.vector_store %arg3[%c0, %c0_2, %c0_3], %11 {strides = array<i32>} : memref<1x8x128xf32, #tpu.memory_space<vmem>>, vector<1x8x128xf32>,
    } else {
    }
    return
  }
  func.func @transform_1(%arg0: i32, %arg1: memref<2xi32, #tpu.memory_space<smem>>) -> (i32, i32, i32) {
    %c0_i32 = arith.constant 0 : i32
    %c0_i32_0 = arith.constant 0 : i32
    %c0_i32_1 = arith.constant 0 : i32
    return %arg0, %c0_i32, %c0_i32_0 : i32, i32, i32
  }
}

</mosaic_0001>

<bundles_post_ra>
// kernel: tpu_custom_call.1
= control target key start
LH: loop header
LB: loop body
LE: loop exit
PB: predicated region body
PF: predicated region fallthrough
CT: control target
= control target key end

     0   :  { %s296_s12 = smov [#allocation5]   ;;  %s407_s0 = inlined_call_operand.hbm [shape: s32[2], index: 0, kind: input, shape index: {}]   ;;  %s408_s1 = inlined_call_operand.hbm [shape: f32[2,8,128], index: 1, kind: input, shape index: {}]   ;;  %s409_s2 = inlined_call_operand.hbm [shape: f32[2,8,128], index: 2, kind: output, shape index: {}]  }
   0x1   :  { %s8_s11 = sshll.u32 %s407_s0, 4  ;;  %s9_s11 = int_to_ptr.hbm [resolvable:$true] %s8_s11 }
   0x2   :  { %11 = dma.hbm_to_smem %s9_s11, 16, %s296_s12, [#allocation4] }
   0x3   :  { %276 = dma.done.wait [#allocation4], 16 }
   0x4   :  { %277 = vsyncadd [#allocation4], 4294967280 }
   0x5   :  { %14 = sfence }
   0x6   :  { %15 = vsyncpa [#allocation7], 0 }
   0x7   :  { %17 = vsyncpa [#allocation7 + $0x1], 0  ;;  %s317_s13 = smov 0   ;;  %s319_s14 = smov 0  }
   0x8   :  { %s321_s15 = smov 0  }
   0x9 LB: > { %s154_s0 = sadd.s32 4294967295, %s294_s15   ;;  %s334_s16 = sadd.s32 1, %s294_s15   ;;  %s294_s15 = sphi %s321_s15, %s414_s15   ;;  %s290_s14 = sphi %s319_s14, %s413_s14   ;;  %s286_s13 = sphi %s317_s13, %s412_s13  }
   0xa   : > { %s26_s17 = ssub.s32 %s294_s15, %s334_s16  ;;  %s29_s18 = sadd.s32 1, %s290_s14 }
   0xb   : > { %p27_p0 = scmp.eq.s32.totalorder %s26_s17, 0  ;;  %p155_p1 = scmp.ne.s32.totalorder %s26_s17, 0 }
   0xc   : > { %p33_p2 = scmp.eq.s32.totalorder %s294_s15, 1  ;;  %p38_p3 = scmp.ne.s32.totalorder %s290_s14, %s286_s13 }
   0xd   : > { %s343_s19 = scalar_select %p27_p0, %s290_s14, %s29_s18  }
   0xe   : > { %p345_p4 = por %p155_p1, %p33_p2  ;;  %p39_p5 = scmp.eq.s32.totalorder %s154_s0, 1 }
   0xf   : > { %p156_p7 = scmp.ge.s32.totalorder %s294_s15, 2 }
  0x10   : > { %p349_p6 = por %p39_p5, %p38_p3  ;;  %s53_s22 = sand.u32 (!%p156_p7), 1, %s290_s14  }
  0x11   : > { %48 = sbr.rel (%p156_p7) target bundleno = 66 (0x42), region = 12  ;;  %s356_s23 = sld [smem:[#allocation5 + %s294_s15]] (!%p156_p7) }
  0x12   : > { %s157_s24 = sshll.u32 (!%p156_p7), %s53_s22, 3 }
  0x13   : > { %s360_s25 = scalar_lea.vmem (!%p156_p7), [#allocation6], %s157_s24 }
  0x17   : > { %p158_p8 = scmp.eq.s32.totalorder %s356_s23, 0 }
  0x18   : > { %s159_s26 = sshll.u32 (!%p158_p8), %s294_s15, 3  ;;  %s297_s30 = smov (!%p158_p8), [#allocation2]  }
  0x19   : > { %60 = sbr.rel (%p158_p8) target bundleno = 42 (0x2a), region = 16  ;;  %s62_s29 = scalar_lea.hbm (!%p158_p8), %s408_s1, %s159_s26 }
  0x1a   : > { %s72_s3 = sshll.u32 (!%p158_p8), %s297_s30, 4  ;;  %s70_s4 = sshll.u32 (!%p158_p8), %s62_s29, 4  ;;  %s73_s3 = int_to_ptr.vmem [resolvable:$true] %s72_s3  ;;  %s71_s4 = int_to_ptr.hbm [resolvable:$true] %s70_s4 }
  0x1b   : > { %s212_s5 = sshra.s32 (!%p158_p8), %s71_s4, 4  ;;  %s216_s9 = scalar_lea.hbm (!%p158_p8), %s408_s1, 16  ;;  %s213_s5 = int_to_ptr.hbm [resolvable:$true] %s212_s5 }
  0x1c   : > { %s214_s6 = scalar_lea.hbm (!%p158_p8), %s213_s5, 8  ;;  %p217_p10 = scmp.lt.s32.totalorder (!%p158_p8), %s213_s5, %s408_s1 }
  0x1d   : > { %p215_p9 = scmp.ne.s32.totalorder (!%p158_p8), %s213_s5, %s214_s6  ;;  %p218_p11 = scmp.lt.s32.totalorder (!%p158_p8), %s216_s9, %s214_s6 }
  0x1f   : > { %p219_p12 = por %p218_p11, %p217_p10 }
  0x21   : > { %p220_p13 = pnand %p219_p12, %p215_p9 }
  0x23   : > { %223 = shalt.err (!%p220_p13)  }
  0x24   : > { %75 = dma.hbm_to_vmem [thread:$0]  %s71_s4, 128, %s73_s3, [#allocation3] }
  0x25   : > { %278 = dma.done.wait [#allocation3], 128 }
  0x26   : > { %279 = vsyncadd [#allocation3], 4294967168  ;;  %v79_v0 = vld [vmem:[#allocation2] sm:$0xff] }
  0x27   : > { %v80_v1 = vmul.f32 1.25, %v79_v0 }
  0x29   : > { %81 = vst [vmem:[%s360_s25] sm:$0xff] %v80_v1 }
  0x2a PF: > { %p160_p0 = scmp.ne.s32.totalorder %s356_s23, 0 }
  0x2c   : > { %85 = sbr.rel (%p160_p0) target bundleno = 51 (0x33), region = 24 }
  0x31   : > { %v298_v2 = vmov 0.0  }
  0x32   : > { %86 = vst [vmem:[%s360_s25] sm:$0xff] %v298_v2 }
  0x33 PF: > { %s162_s12 = sshll.u32 %s294_s15, 3  ;;  %s100_s24 = sshll.u32 %s360_s25, 4  ;;  %s101_s24 = int_to_ptr.vmem [resolvable:$true] %s100_s24 }
  0x34   : > { %s98_s18 = scalar_lea.hbm %s409_s2, %s162_s12  ;;  %s88_s23 = scalar_lea.sflag [#allocation7], %s53_s22 }
  0x35   : > { %s102_s26 = sshll.u32 %s98_s18, 4  ;;  %s256_s3 = scalar_lea.hbm %s409_s2, 16  ;;  %s103_s26 = int_to_ptr.hbm [resolvable:$true] %s102_s26 }
  0x36   : > { %s250_s27 = sshra.s32 %s103_s26, 4  ;;  %s251_s27 = int_to_ptr.hbm [resolvable:$true] %s250_s27 }
  0x37   : > { %s252_s28 = scalar_lea.hbm %s251_s27, 8  ;;  %p257_p5 = scmp.lt.s32.totalorder %s251_s27, %s409_s2 }
  0x38   : > { %p253_p1 = scmp.ne.s32.totalorder %s251_s27, %s252_s28  ;;  %p258_p7 = scmp.lt.s32.totalorder %s256_s3, %s252_s28 }
  0x3a   : > { %p254_p2 = pnand %p253_p1, %p345_p4  ;;  %p259_p8 = por %p258_p7, %p257_p5 }
  0x3c   : > { %p255_p3 = pneg %p254_p2 }
  0x3e   : > { %p260_p9 = pnand %p259_p8, %p255_p3 }
  0x40   : > { %263 = shalt.err (!%p260_p9)
}
  0x41   : > { %166 = dma.vmem_to_hbm [thread:$0]  (%p345_p4), %s101_s24, 128, %s103_s26, %s88_s23  }
  0x42 PF: > { %p172_p10 = scmp.ge.s32.totalorder %s294_s15, 1  ;;  %s114_s22 = sand.u32 1, %s286_s13  }
  0x43   : > { %s115_s25 = scalar_lea.sflag [#allocation7], %s114_s22 }
  0x44   : > { %p169_p11 = pnand %p172_p10, %p349_p6 }
  0x46   : > { %p170_p12 = pneg %p169_p11 }
  0x48   : > { %281 = dma.done.wait (%p170_p12), %s115_s25, 128  }
  0x49   : > { %283 = vsyncadd (%p170_p12), %s115_s25, 4294967168  ;;  %p20_p13 = scmp.ge.s32.totalorder %s334_s16, 3   ;;  %s412_s13 = smov %s290_s14 }
  0x4a   : > { %s413_s14 = smov %s343_s19  ;;  %s414_s15 = smov %s334_s16 }
  0x4b   :  { %22 = sbr.rel (!%p20_p13) target bundleno = 9 (0x9), region = 57 }
  0x50   :  { %121 = vsyncpa [#allocation7], 1 }
  0x51   :  { %123 = vsyncpa [#allocation7 + $0x1], 1 }
  0x52   :  { %124 = vsyncmov [#allocation3] }
  0x55   :  { %s125_s15 = vpop.sfrf %124 }
  0x56   :  { %p165_p4 = scmp.ne.s32.totalorder %s125_s15, 0 }
  0x58   :  { %129 = shalt.err (%p165_p4)  }

</bundles_post_ra>
